<compile_context>
chip_gen: v6e
topology: v6e:2x2x1
jax: 0.10.0
libtpu: 0.0.40
codegen_flags: <defaults>
</compile_context>

<pallas_src>
import jax
import jax.numpy as jnp
import numpy as np
from jax.experimental import pallas as pl
from jax.experimental.pallas import tpu as pltpu


def _round_up(v, m):
    return (v + m - 1) // m * m


def gap_kernel(x_ref, m_ref, agg_ref, w_root_ref, b_ref, o_ref):
    x = x_ref[...]                                    # [Np, Hp] f32
    m = m_ref[...]                                    # [Np, Gp] f32 one-hot

    # GraphConv(H, 1): rel-branch aggregate is precomputed (reassociated, [Np,1]);
    # root-branch projection on the VPU (mul) + XLU (lane reduce); bias from SMEM.
    r = jnp.sum(x * w_root_ref[...], axis=1, keepdims=True)          # [Np, 1]
    xc = agg_ref[...] + r + b_ref[0, 0]                              # [Np, 1]

    # Segment (per-graph) softmax over nodes, NaN-safe for empty / padded graphs.
    neg_big = jnp.float32(-3e38)                 # finite sentinel: no 0*(-inf)=NaN
    masked = jnp.where(m > 0, xc, neg_big)                           # [Np, Gp]
    seg_max = jnp.max(masked, axis=0, keepdims=True)                 # [1, Gp]
    node_max = jnp.sum(m * seg_max, axis=1, keepdims=True)           # [Np, 1]
    e = jnp.exp(xc - node_max)                                       # [Np, 1]
    seg_sum = jnp.sum(m * e, axis=0, keepdims=True)                  # [1, Gp]
    node_sum = jnp.sum(m * seg_sum, axis=1, keepdims=True)           # [Np, 1]
    inv = pl.reciprocal(node_sum, approx=True)                       # EUP slot
    scores = jnp.where(node_sum > 0, e * inv, 0.0)                   # [Np, 1]

    # global_add_pool(x * scores, batch): single MXU matmul, bf16 operands,
    # f32 accumulation.
    xs = (x * scores).astype(jnp.bfloat16)                           # [Np, Hp]
    mb = m.astype(jnp.bfloat16)                                      # [Np, Gp]
    gx = jax.lax.dot_general(mb, xs, (((0,), (0,)), ((), ())),
                             preferred_element_type=jnp.float32)     # [Gp, Hp]
    o_ref[...] = gx


def global_attention_pool(x, edge_index, batch, w_root, w_rel, bias, num_graphs):
    """Wrapper: O(E)/O(N) glue (reassociated rel-branch scatter, one-hot membership,
    lane/sublane zero-padding), then one Pallas call for all dense work."""
    n, h = x.shape
    n_pad = _round_up(n, 8)
    h_pad = _round_up(h, 128)            # lane-dense x block and output store
    g_pad = _round_up(num_graphs, 8)

    src, dst = edge_index[0], edge_index[1]

    # Reassociated GraphConv rel-branch: v = x @ w_rel ; agg[i] = sum_{e: dst=i} v[src[e]]
    # TODO(synk): this data-dependent edge scatter stays as an XLA scatter; an
    # in-kernel equivalent would need a serial SMEM edge loop (no parallel Pallas op).
    v = (x @ w_rel)[:, 0]                                            # [N]
    agg = jnp.zeros((n,), jnp.float32).at[dst].add(v[src])           # [N]

    # One-hot graph membership M[N, G]
    m = (batch[:, None] == jnp.arange(num_graphs)[None, :]).astype(jnp.float32)

    # Zero-pad to TPU-friendly shapes (padded nodes get score 0; padded graphs /
    # feature lanes are sliced off below).
    x_p = jnp.zeros((n_pad, h_pad), jnp.float32).at[:n, :h].set(x)
    m_p = jnp.zeros((n_pad, g_pad), jnp.float32).at[:n, :num_graphs].set(m)
    agg_p = jnp.zeros((n_pad, 1), jnp.float32).at[:n, 0].set(agg)
    w_root_p = jnp.zeros((1, h_pad), jnp.float32).at[0, :h].set(w_root[:, 0])
    b = jnp.asarray(bias, jnp.float32).reshape(1, 1)

    cost = pl.CostEstimate(
        flops=2 * n_pad * g_pad * h_pad + 2 * n_pad * h_pad + 8 * n_pad * g_pad,
        transcendentals=2 * n_pad,
        bytes_accessed=4 * (n_pad * h_pad + n_pad * g_pad + n_pad + h_pad + 1
                            + g_pad * h_pad),
    )

    gx_p = pl.pallas_call(
        gap_kernel,
        out_shape=jax.ShapeDtypeStruct((g_pad, h_pad), jnp.float32),
        in_specs=[
            pl.BlockSpec(memory_space=pltpu.MemorySpace.VMEM),   # x (padded)
            pl.BlockSpec(memory_space=pltpu.MemorySpace.VMEM),   # membership one-hot
            pl.BlockSpec(memory_space=pltpu.MemorySpace.VMEM),   # rel-branch aggregate
            pl.BlockSpec(memory_space=pltpu.MemorySpace.VMEM),   # w_root row [1, Hp]
            pl.BlockSpec(memory_space=pltpu.MemorySpace.SMEM),   # bias scalar
        ],
        out_specs=pl.BlockSpec(memory_space=pltpu.MemorySpace.VMEM),
        cost_estimate=cost,
    )(x_p, m_p, agg_p, w_root_p, b)
    # NOTE: for production N, grid over node-row blocks with an online (flash-style)
    # segment softmax and dimension_semantics=("parallel",) for v7x megacore.
    return gx_p[:num_graphs, :h]


def reference(x, edge_index, batch, w_root, w_rel, bias, num_graphs):
    """Pure-JAX f32 reference of the PyTorch forward."""
    src, dst = edge_index[0], edge_index[1]
    agg = jnp.zeros_like(x).at[dst].add(x[src])
    xc = agg @ w_rel + x @ w_root + bias                              # [N, 1]
    seg_max = jax.ops.segment_max(xc[:, 0], batch, num_segments=num_graphs)
    e = jnp.exp(xc[:, 0] - seg_max[batch])
    seg_sum = jax.ops.segment_sum(e, batch, num_segments=num_graphs)
    scores = (e / seg_sum[batch])[:, None]
    gx = jax.ops.segment_sum(x * scores, batch, num_segments=num_graphs)
    return gx


if __name__ == "__main__":
    key = jax.random.PRNGKey(0)
    N, H, G = 16, 32, 2            # 16 nodes, hidden_dim=32, 2 graphs (8 nodes each)
    E_per_graph = 12

    k_x, k_wr, k_wl, k_b, k_e0, k_e1 = jax.random.split(key, 6)

    x = jax.random.normal(k_x, (N, H), jnp.float32)
    batch = jnp.concatenate([jnp.zeros(8, jnp.int32), jnp.ones(8, jnp.int32)])

    # edges within each graph (graph 0: nodes 0..7, graph 1: nodes 8..15)
    e0 = jax.random.randint(k_e0, (2, E_per_graph), 0, 8)
    e1 = jax.random.randint(k_e1, (2, E_per_graph), 0, 8) + 8
    edge_index = jnp.concatenate([e0, e1], axis=1)                    # [2, 24]

    # GraphConv(hidden_dim=32, out_channels=1) parameters:
    #   lin_root: weight [1, H] no bias ; lin_rel: weight [1, H] + bias [1]
    w_root = jax.random.normal(k_wr, (H, 1), jnp.float32) / jnp.sqrt(H)
    w_rel = jax.random.normal(k_wl, (H, 1), jnp.float32) / jnp.sqrt(H)
    bias = jax.random.normal(k_b, (1, 1), jnp.float32) * 0.1

    gx = global_attention_pool(x, edge_index, batch, w_root, w_rel, bias, G)
    gx = jax.block_until_ready(gx)

    ref = reference(x, edge_index, batch, w_root, w_rel, bias, G)
    # Tolerance reflects bf16 MXU operands (f32 accumulation) + approx EUP reciprocal.
    np.testing.assert_allclose(np.asarray(gx), np.asarray(ref), rtol=2e-2, atol=2e-2)

    print("KERNEL_OK")
</pallas_src>

<mosaic_0001>
module attributes {stable_mosaic.version = 11 : i64} {
  func.func @gap_kernel(%arg0: memref<16x128xf32, #tpu.memory_space<vmem>>, %arg1: memref<16x8xf32, #tpu.memory_space<vmem>>, %arg2: memref<16x1xf32, #tpu.memory_space<vmem>>, %arg3: memref<1x128xf32, #tpu.memory_space<vmem>>, %arg4: memref<1x1xf32, #tpu.memory_space<smem>>, %arg5: memref<8x128xf32, #tpu.memory_space<vmem>>) attributes {dimension_semantics = [], scalar_prefetch = 0 : i64, scratch_operands = 0 : i64, tpu.core_type = #tpu.core_type<tc>} {
    %c0 = arith.constant 0 : index
    %c0_0 = arith.constant 0 : index
    %0 = vector.load %arg0[%c0, %c0_0] : memref<16x128xf32, #tpu.memory_space<vmem>>, vector<16x128xf32>
    %c0_1 = arith.constant 0 : index
    %c0_2 = arith.constant 0 : index
    %1 = vector.load %arg1[%c0_1, %c0_2] : memref<16x8xf32, #tpu.memory_space<vmem>>, vector<16x8xf32>
    %c0_3 = arith.constant 0 : index
    %c0_4 = arith.constant 0 : index
    %2 = vector.load %arg3[%c0_3, %c0_4] : memref<1x128xf32, #tpu.memory_space<vmem>>, vector<1x128xf32>
    %3 = vector.broadcast %2 : vector<1x128xf32> to vector<16x128xf32>
    %4 = arith.mulf %0, %3 : vector<16x128xf32>
    %cst = arith.constant dense<0.000000e+00> : vector<16xf32>
    %5 = vector.multi_reduction <add>, %4, %cst [1] : vector<16x128xf32> to vector<16xf32>
    %6 = vector.shape_cast %5 : vector<16xf32> to vector<16x1xf32>
    %c0_5 = arith.constant 0 : index
    %c0_6 = arith.constant 0 : index
    %7 = vector.load %arg2[%c0_5, %c0_6] : memref<16x1xf32, #tpu.memory_space<vmem>>, vector<16x1xf32>
    %8 = arith.addf %7, %6 : vector<16x1xf32>
    %c0_7 = arith.constant 0 : index
    %c0_8 = arith.constant 0 : index
    %9 = memref.load %arg4[%c0_7, %c0_8] : memref<1x1xf32, #tpu.memory_space<smem>>
    %10 = vector.broadcast %9 : f32 to vector<16x1xf32>
    %11 = arith.addf %8, %10 : vector<16x1xf32>
    %cst_9 = arith.constant 0.000000e+00 : f32
    %12 = vector.broadcast %cst_9 : f32 to vector<16x8xf32>
    %13 = arith.cmpf ogt, %1, %12 : vector<16x8xf32>
    %cst_10 = arith.constant -3.000000e+38 : f32
    %14 = vector.shape_cast %11 : vector<16x1xf32> to vector<16x1xf32>
    %15 = vector.broadcast %14 : vector<16x1xf32> to vector<16x8xf32>
    %16 = vector.broadcast %cst_10 : f32 to vector<16x8xf32>
    %17 = arith.select %13, %15, %16 : vector<16x8xi1>, vector<16x8xf32>
    %cst_11 = arith.constant dense<0xFF800000> : vector<8xf32>
    %18 = vector.multi_reduction <maximumf>, %17, %cst_11 [0] : vector<16x8xf32> to vector<8xf32>
    %19 = vector.shape_cast %18 : vector<8xf32> to vector<1x8xf32>
    %20 = vector.broadcast %19 : vector<1x8xf32> to vector<16x8xf32>
    %21 = arith.mulf %1, %20 : vector<16x8xf32>
    %cst_12 = arith.constant dense<0.000000e+00> : vector<16xf32>
    %22 = vector.multi_reduction <add>, %21, %cst_12 [1] : vector<16x8xf32> to vector<16xf32>
    %23 = vector.shape_cast %22 : vector<16xf32> to vector<16x1xf32>
    %24 = arith.subf %11, %23 : vector<16x1xf32>
    %25 = math.exp %24 : vector<16x1xf32>
    %26 = vector.broadcast %25 : vector<16x1xf32> to vector<16x8xf32>
    %27 = arith.mulf %1, %26 : vector<16x8xf32>
    %cst_13 = arith.constant dense<0.000000e+00> : vector<8xf32>
    %28 = vector.multi_reduction <add>, %27, %cst_13 [0] : vector<16x8xf32> to vector<8xf32>
    %29 = vector.shape_cast %28 : vector<8xf32> to vector<1x8xf32>
    %30 = vector.broadcast %29 : vector<1x8xf32> to vector<16x8xf32>
    %31 = arith.mulf %1, %30 : vector<16x8xf32>
    %cst_14 = arith.constant dense<0.000000e+00> : vector<16xf32>
    %32 = vector.multi_reduction <add>, %31, %cst_14 [1] : vector<16x8xf32> to vector<16xf32>
    %33 = vector.shape_cast %32 : vector<16xf32> to vector<16x1xf32>
    %34 = tpu.reciprocal %33 {approx = true} : vector<16x1xf32> -> vector<16x1xf32>
    %cst_15 = arith.constant 0.000000e+00 : f32
    %35 = vector.broadcast %cst_15 : f32 to vector<16x1xf32>
    %36 = arith.cmpf ogt, %33, %35 : vector<16x1xf32>
    %37 = arith.mulf %25, %34 : vector<16x1xf32>
    %cst_16 = arith.constant 0.000000e+00 : f32
    %38 = vector.broadcast %cst_16 : f32 to vector<16x1xf32>
    %39 = arith.select %36, %37, %38 : vector<16x1xi1>, vector<16x1xf32>
    %40 = vector.broadcast %39 : vector<16x1xf32> to vector<16x128xf32>
    %41 = arith.mulf %0, %40 : vector<16x128xf32>
    %42 = arith.truncf %41 : vector<16x128xf32> to vector<16x128xbf16>
    %43 = arith.truncf %1 : vector<16x8xf32> to vector<16x8xbf16>
    %cst_17 = arith.constant dense<0.000000e+00> : vector<8x128xf32>
    %44 = tpu.matmul %43, %42, %cst_17 {dimension_numbers = #tpu.dot_dimension_numbers<[0], [0], [1], [1], [0, 1, 1, 1], [], []>} : vector<16x8xbf16>, vector<16x128xbf16>, vector<8x128xf32> -> vector<8x128xf32>
    %c0_18 = arith.constant 0 : index
    %c0_19 = arith.constant 0 : index
    %45 = vector.load %arg5[%c0_18, %c0_19] : memref<8x128xf32, #tpu.memory_space<vmem>>, vector<8x128xf32>
    tpu.vector_store %arg5[%c0_18, %c0_19], %44 {strides = array<i32>} : memref<8x128xf32, #tpu.memory_space<vmem>>, vector<8x128xf32>,
    return
  }
}

</mosaic_0001>

<bundles_post_ra>
// kernel: tpu_custom_call.1
= control target key start
LH: loop header
LB: loop body
LE: loop exit
PB: predicated region body
PF: predicated region fallthrough
CT: control target
= control target key end

     0   :  { %s349_s0 = inlined_call_operand.vmem [shape: f32[16,128], index: 0, kind: input, shape index: {}]   ;;  %s350_s1 = inlined_call_operand.vmem [shape: f32[16,8], index: 1, kind: input, shape index: {}]   ;;  %s351_s2 = inlined_call_operand.vmem [shape: f32[16,1], index: 2, kind: input, shape index: {}]   ;;  %s352_s3 = inlined_call_operand.vmem [shape: f32[1,128], index: 3, kind: input, shape index: {}]   ;;  %s353_s4 = inlined_call_operand.<no memory space> [shape: f32[1,1], index: 4, kind: input, shape index: {}]   ;;  %s354_s5 = inlined_call_operand.hbm [shape: f32[8,128], index: 5, kind: output, shape index: {}]  }
   0x1   :  { %v295_v0 = vld [vmem:[%s349_s0] sm:$0xff]  ;;  %v303_v2 = vld [vmem:[%s349_s0 + $0x8] sm:$0xff] }
   0x2   :  { %v212_v1 = vld [vmem:[%s352_s3] ss:$0 sm:$0xff] }
   0x3   :  { %v34_v3 = vmul.f32 %v212_v1, %v295_v0 }
   0x4   :  { %11 = vsyncpa [#allocation4], 0  ;;  %v35_v4 = vmul.f32 %v212_v1, %v303_v2  ;;  %v258_v5 = vmov 0   ;;  %v40_v6 = vld [vmem:[%s351_s2] sm:$0xff]  ;;  %v45_v8 = vstv %s353_s4  ;;  %v41_v10 = vld [vmem:[%s351_s2 + $0x8] sm:$0xff]  ;;  %vm62_vm2 = vcmask 64512  }
   0x5   :  { %36 = vadd.xlane.f32.xlu0 %v34_v3  ;;  %226 = vset.pattern.permute.xlu1 %v258_v5  ;;  %v319_v15 = vld [vmem:[%s350_s1] sm:$0xff]  ;;  %v324_v16 = vld [vmem:[%s350_s1 + $0x8] sm:$0xff]  ;;  %v259_v3 = vmov 0.0   ;;  %vm260_vm5 = vmmov 0   ;;  %vm153_vm6 = vcmask 130048   ;;  %s261_s1 = smov [#allocation3]  }
   0x6   :  { %227 = vset.pattern.permute.xlu0 %v258_v5  ;;  %vm48_vm0 = vcmp.gt.f32.partialorder %v319_v15, 0.0  ;;  %vm49_vm1 = vcmp.gt.f32.partialorder %v324_v16, 0.0  ;;  %216 = vmatprep.subr.bf16.mxu0 %v259_v3  ;;  %s204_s2 = sshll.u32 %s261_s1, 4  ;;  %s205_s2 = int_to_ptr.vmem [resolvable:$true] %s204_s2 }
   0x7   :  { %218 = vmatprep.mubr.msk.bf16.mxu0 %vm260_vm5, %v259_v3  ;;  %s236_s4 = scalar_lea.vmem %s205_s2, 128  ;;  %p241_p1 = scmp.lt.s32.totalorder %s205_s2, %s205_s2 }
   0x8   :  { %p237_p0 = scmp.ne.s32.totalorder %s205_s2, %s236_s4  ;;  %p242_p2 = scmp.lt.s32.totalorder %s236_s4, %s236_s4 }
   0x9   :  { %38 = vadd.xlane.f32.xlu0 %v35_v4 }
   0xa   :  { %p243_p3 = por %p242_p2, %p241_p1 }
   0xc   :  { %p244_p4 = pnand %p243_p3, %p237_p0 }
  0x8e   :  { %v37_v7 = vpop.xlane.xlu0 %36 }
  0x8f   :  { %v42_v9 = vadd.f32 %v40_v6, %v37_v7  ;;  %v136_v6 = vpack.c.bf16 %v324_v16, %v319_v15 }
  0x91   :  { %v46_v11 = vadd.f32 %v45_v8, %v42_v9 }
  0x92   :  { %v39_v12 = vpop.xlane.xlu0 %38 }
  0x93   :  { %v43_v13 = vadd.f32 %v41_v10, %v39_v12  ;;  %52 = vperm.xlu1 %226, %v46_v11  }
  0x95   :  { %v47_v14 = vadd.f32 %v45_v8, %v43_v13 }
  0x97   :  { %57 = vperm.xlu1 %226, %v47_v14  }
 0x10e   :  { %v53_v17 = vpop.permute.xlu1 %52 }
 0x10f   :  { %v60_v18 = vsel %vm48_vm0, %v53_v17, -3e+38 }
 0x110   :  { %v63_v21 = vsel %vm62_vm2, %v60_v18, -inf }
 0x112   :  { %v58_v19 = vpop.permute.xlu1 %57 }
 0x113   :  { %v61_v20 = vsel %vm49_vm1, %v58_v19, -3e+38 }
 0x114   :  { %v64_v22 = vsel %vm62_vm2, %v61_v20, -inf }
 0x115   :  { %v65_v23 = vmax.f32 %v63_v21, %v64_v22 }
 0x117   :  { %v66_v24 = vrot.slane %v65_v23, 4 }
 0x119   :  { %v67_v25 = vmax.f32 %v65_v23, %v66_v24 }
 0x11b   :  { %v68_v26 = vrot.slane %v67_v25, 2 }
 0x11d   :  { %v69_v27 = vmax.f32 %v67_v25, %v68_v26 }
 0x11f   :  { %v70_v28 = vrot.slane %v69_v27, 1 }
 0x121   :  { %v71_v29 = vmax.f32 %v69_v27, %v70_v28 }
 0x123   :  { %v73_v30 = vmul.f32 %v71_v29, %v324_v16  ;;  %v72_v31 = vmul.f32 %v71_v29, %v319_v15 }
 0x125   :  { %v77_v32 = vsel %vm62_vm2, %v73_v30, 0.0  ;;  %v74_v33 = vsel %vm62_vm2, %v72_v31, 0.0 }
 0x126   :  { %78 = vadd.xlane.f32.xlu1 %v77_v32  ;;  %75 = vadd.xlane.f32.xlu0 %v74_v33 }
 0x1af   :  { %v79_v34 = vpop.xlane.xlu1 %78  ;;  %v76_v35 = vpop.xlane.xlu0 %75 }
 0x1b0   :  { %v81_v36 = vsub.f32 %v47_v14, %v79_v34  ;;  %v80_v37 = vsub.f32 %v46_v11, %v76_v35 }
 0x1b2   :  { %v84_v38 = vmul.f32 1.442695, %v81_v36  ;;  %v82_v39 = vmul.f32 1.442695, %v80_v37 }
 0x1b4   :  { %228 = vpow2.f32 %v84_v38 }
 0x1b5   :  { %230 = vpow2.f32 %v82_v39 }
 0x1c1   :  { %v229_v40 = vpop.eup %228 }
 0x1c2   :  { %v231_v41 = vpop.eup %230  ;;  %93 = vperm.xlu1 %226, %v229_v40  }
 0x1c3   :  { %88 = vperm.xlu0 %227, %v231_v41  }
 0x23d   :  { %v94_v42 = vpop.permute.xlu1 %93 }
 0x23e   :  { %v97_v43 = vmul.f32 %v94_v42, %v324_v16  ;;  %v89_v44 = vpop.permute.xlu0 %88 }
 0x23f   :  { %v96_v45 = vmul.f32 %v89_v44, %v319_v15 }
 0x240   :  { %v99_v46 = vsel %vm62_vm2, %v97_v43, 0.0 }
 0x241   :  { %v98_v47 = vsel %vm62_vm2, %v96_v45, 0.0 }
 0x242   :  { %v100_v48 = vadd.f32 %v99_v46, %v98_v47 }
 0x244   :  { %v101_v49 = vrot.slane %v100_v48, 4 }
 0x246   :  { %v102_v50 = vadd.f32 %v101_v49, %v100_v48 }
 0x248   :  { %v103_v51 = vrot.slane %v102_v50, 2 }
 0x24a   :  { %v104_v52 = vadd.f32 %v103_v51, %v102_v50 }
 0x24c   :  { %v105_v53 = vrot.slane %v104_v52, 1 }
 0x24e   :  { %v106_v54 = vadd.f32 %v105_v53, %v104_v52 }
 0x250   :  { %v108_v55 = vmul.f32 %v106_v54, %v324_v16  ;;  %v107_v56 = vmul.f32 %v106_v54, %v319_v15 }
 0x252   :  { %v112_v57 = vsel %vm62_vm2, %v108_v55, 0.0  ;;  %v109_v58 = vsel %vm62_vm2, %v107_v56, 0.0 }
 0x253   :  { %113 = vadd.xlane.f32.xlu1 %v112_v57  ;;  %110 = vadd.xlane.f32.xlu0 %v109_v58 }
 0x2dc   :  { %v114_v59 = vpop.xlane.xlu1 %113  ;;  %v111_v60 = vpop.xlane.xlu0 %110 }
 0x2dd   :  { %232 = vrcp.f32 %v114_v59  ;;  %vm118_vm3 = vcmp.gt.f32.partialorder %v114_v59, 0.0  ;;  %vm117_vm4 = vcmp.gt.f32.partialorder %v111_v60, 0.0 }
 0x2de   :  { %234 = vrcp.f32 %v111_v60 }
 0x2ea   :  { %v233_v61 = vpop.eup %232 }
 0x2eb   :  { %v235_v62 = vpop.eup %234  ;;  %v120_v63 = vmul.f32 %v233_v61, %v229_v40 }
 0x2ec   :  { %v119_v1 = vmul.f32 %v235_v62, %v231_v41 }
 0x2ed   :  { %v122_v4 = vsel %vm118_vm3, %v120_v63, 0.0 }
 0x2ee   :  { %130 = vperm.xlu1 %226, %v122_v4   ;;  %v121_v5 = vsel %vm117_vm4, %v119_v1, 0.0 }
 0x2ef   :  { %125 = vperm.xlu0 %227, %v121_v5  }
 0x30d   :  { %137 = vxpose.xlu0.c.b16.start.end [1/1] (short) (narrow) %v136_v6, 16 }
 0x369   :  { %v131_v7 = vpop.permute.xlu1 %130 }
 0x36a   :  { %v134_v8 = vmul.f32 %v131_v7, %v303_v2  ;;  %v126_v9 = vpop.permute.xlu0 %125 }
 0x36b   :  { %v133_v10 = vmul.f32 %v126_v9, %v295_v0 }
 0x36d   :  { %v135_v11 = vpack.c.bf16 %v134_v8, %v133_v10 }
 0x36f   :  { %217 = vmatpush3.bf16.msra.mxu0 %v135_v11  ;;  %v145_v12 = vpop.trf.xlu0 }
 0x372   :  { %219 = vmatmul.mubr.msk.bf16.vlgmr.msra.gmra.mxu0 %vm153_vm6, %v145_v12 }
 0x432   :  { %v191_v13 = vpop.f32.mrf.mxu0 }
 0x433   :  { %197 = vst [vmem:[#allocation3] sm:$0xff] %v191_v13 }
 0x434   :  { %v220_v14 = vpop.f32.mrf.mxu0 }
 0x435   :  { %247 = shalt.err (!%p244_p4)
}
 0x436   :  { %207 = dma.vmem_to_hbm [thread:$0]  %s205_s2, 128, %s354_s5, [#allocation4]   ;;  %v194_v0 = vpop.f32.mrf.mxu0 }
 0x438   :  { %v221_v2 = vpop.f32.mrf.mxu0 }
 0x439   :  { %256 = dma.done.wait [#allocation4], 128  }
 0x43a   :  { %257 = vsyncadd [#allocation4], 4294967168 }
 0x43b   :  { %211 = vsyncpa [#allocation4], 1 }

</bundles_post_ra>
